<compile_context>
chip_gen: v7x
topology: tpu7x:2x2x1
jax: 0.10.0
libtpu: 0.0.40
codegen_flags: <defaults>
</compile_context>

<pallas_src>
import functools
import math

import jax
import jax.numpy as jnp
from jax import lax
from jax.experimental import pallas as pl
from jax.experimental.pallas import tpu as pltpu


def _round_up(x, m):
    return (x + m - 1) // m * m


# ----------------------------------------------------------------------------
# Path A: small Cin  -> wrapper-side im2col + lane-dense tiled matmul kernel
# ----------------------------------------------------------------------------
def _matmul_bias_relu_kernel(p_ref, w_ref, bias_ref, o_ref):
    acc = jnp.dot(p_ref[...], w_ref[...], preferred_element_type=jnp.float32)
    o_ref[...] = jnp.maximum(acc + bias_ref[...], 0.0).astype(o_ref.dtype)


def _im2col_matmul_path(x_pad, w2d, bias, *, n, ho, wo, cin, kh, kw, stride,
                        out_dtype):
    """x_pad: (N, Hp, Wp, Cin) bf16; w2d: (KH*KW*Cin, Cout_p) bf16 (BN folded);
    bias: (1, Cout_p) f32.  Returns (N*Ho*Wo, Cout_p)."""
    # Wrapper-side im2col (plain XLA) so the kernel's minor dims are lane-dense.
    cols = []
    for ki in range(kh):
        for kj in range(kw):
            patch = lax.slice(
                x_pad, (0, ki, kj, 0),
                (n, ki + (ho - 1) * stride + 1, kj + (wo - 1) * stride + 1, cin),
                (1, stride, stride, 1))                    # (N, Ho, Wo, Cin)
            cols.append(patch)
    patches = jnp.concatenate(cols, axis=-1).reshape(n * ho * wo, kh * kw * cin)

    m = n * ho * wo
    k = kh * kw * cin
    kp = _round_up(k, 128)                 # lane-dense contraction dim
    cout_p = w2d.shape[1]

    tm = 512 if m >= 512 else _round_up(m, 8)
    m_p = _round_up(m, tm)
    # Largest Cout tile that divides Cout_p (multiples of 256 preferred for
    # the 2x256 MXU on v6e/v7x; 128 always works).
    tn = next(c for c in (512, 384, 256, 128) if cout_p % c == 0)

    patches = jnp.pad(patches, ((0, m_p - m), (0, kp - k)))
    w2d = jnp.pad(w2d, ((0, kp - k), (0, 0)))

    grid = (m_p // tm, cout_p // tn)

    est = (2 * tm * kp * 2          # patches blocks (double-buffered, bf16)
           + 2 * kp * tn * 2        # weight blocks
           + 2 * tn * 4             # bias blocks
           + 2 * tm * tn * 4        # output blocks
           + tm * tn * 4)           # f32 accumulator
    vmem_limit = int(min(64 << 20, max(32 << 20, 2 * est)))

    flops = 2 * m * k * cout_p
    bytes_accessed = int(m_p * kp * 2 + kp * cout_p * 2 + cout_p * 4
                         + m_p * cout_p * jnp.dtype(out_dtype).itemsize)

    out = pl.pallas_call(
        _matmul_bias_relu_kernel,
        out_shape=jax.ShapeDtypeStruct((m_p, cout_p), out_dtype),
        grid=grid,
        in_specs=[
            pl.BlockSpec((tm, kp), lambda i, j: (i, 0)),
            pl.BlockSpec((kp, tn), lambda i, j: (0, j)),
            pl.BlockSpec((1, tn), lambda i, j: (0, j)),
        ],
        out_specs=pl.BlockSpec((tm, tn), lambda i, j: (i, j)),
        compiler_params=pltpu.CompilerParams(
            dimension_semantics=("parallel", "parallel"),
            vmem_limit_bytes=vmem_limit),
        cost_estimate=pl.CostEstimate(flops=flops, transcendentals=0,
                                      bytes_accessed=bytes_accessed),
    )(patches, w2d, bias)
    return out[:m]                                         # (M, Cout_p)


# ----------------------------------------------------------------------------
# Path B: large Cin -> in-kernel im2col with double-buffered halo-row DMA
# ----------------------------------------------------------------------------
def _halo_conv_kernel(x_hbm, w_ref, bias_ref, o_ref,
                      x_vmem, patches_ref, dma_sem, *,
                      kh_size, kw_size, stride, tile_ho, wo, n_tiles):
    """One (batch, Ho-tile) per grid step.

    x_hbm:       (N, Hp, Wp, Cin) bf16 in HBM (memory_space=pl.ANY)
    w_ref:       (KH*KW*Cin, Cout_p) bf16, VMEM-resident (BN scale folded in)
    bias_ref:    (1, Cout_p) f32
    o_ref:       (1, tile_ho*Wo, Cout_p)
    x_vmem:      (2, block_h_in, Wp, Cin) bf16 double-buffered halo slab
    patches_ref: (tile_ho*Wo, KH*KW*Cin) bf16 im2col scratch
    dma_sem:     (2,) DMA semaphores
    """
    b = pl.program_id(0)
    t = pl.program_id(1)
    slot = t % 2
    block_h_in = x_vmem.shape[1]
    cin = x_vmem.shape[3]
    row_step = tile_ho * stride

    def start_fetch(tile_idx, s):
        pltpu.make_async_copy(
            x_hbm.at[b, pl.ds(tile_idx * row_step, block_h_in)],
            x_vmem.at[s], dma_sem.at[s]).start()

    # First tile of this batch image fetches its own slab (keyed on t, not a
    # global step counter, so it remains correct when the batch axis is split
    # across TensorCores).
    @pl.when(t == 0)
    def _():
        start_fetch(0, 0)

    # Prefetch the next tile's slab into the other slot BEFORE computing on
    # the current one: hides the HBM fetch behind the matmul.
    if n_tiles > 1:
        @pl.when(t + 1 < n_tiles)
        def _():
            start_fetch(t + 1, 1 - slot)

    # Wait for the current slot's DMA (descriptor only needs matching shape).
    pltpu.make_async_copy(
        x_hbm.at[b, pl.ds(0, block_h_in)],
        x_vmem.at[slot], dma_sem.at[slot]).wait()

    x = x_vmem[slot]                                       # (block_h_in, Wp, Cin)

    # im2col: write each tap slice straight into the patches scratch at its
    # lane offset (no concatenate -> one live patches buffer, less VPU copy).
    idx = 0
    for ki in range(kh_size):
        for kj in range(kw_size):
            patch = lax.slice(
                x, (ki, kj, 0),
                (ki + (tile_ho - 1) * stride + 1,
                 kj + (wo - 1) * stride + 1,
                 cin),
                (stride, stride, 1))                       # (tile_ho, Wo, Cin)
            patches_ref[:, pl.ds(idx * cin, cin)] = patch.reshape(tile_ho * wo, cin)
            idx += 1

    # Single MXU matmul, bf16 inputs, f32 accumulation; fused bias + ReLU.
    acc = jnp.dot(patches_ref[...], w_ref[...],
                  preferred_element_type=jnp.float32)      # (tile_ho*Wo, Cout_p)
    o_ref[0] = jnp.maximum(acc + bias_ref[...], 0.0).astype(o_ref.dtype)


def _pick_tile_ho_halo(ho, wo, wp, cin, kh, kw, stride, n):
    """Ho tile for the halo-DMA path.

    Guarantees (tile_ho * wo) % 8 == 0 (dense sublane output stores) and keeps
    the double-buffered halo slab and the patches buffer within a few MiB each
    (fits v7x's 64 MiB VMEM) while amortizing the ~0.35us per-step overhead."""
    g = 8 // math.gcd(wo, 8)                       # tile_ho multiple of g
    cap = max(1, 1024 // max(wo, 1))               # ~1024 output rows / step
    in_row_bytes = wp * cin * 2                    # bf16
    max_in_rows = max(kh, (8 << 20) // (2 * in_row_bytes))
    cap = min(cap, max(1, (max_in_rows - kh) // max(stride, 1) + 1))
    patch_row_bytes = wo * kh * kw * cin * 2       # bf16
    cap = min(cap, max(1, (8 << 20) // max(patch_row_bytes, 1)))
    cap = min(cap, ho)
    # Only force an Ho split (for the 2nd TensorCore on v7x) if the batch axis
    # alone provides no grid parallelism.
    if n == 1 and ho > 2 * g:
        cap = min(cap, max(g, (ho + 1) // 2))
    return max(g, (cap // g) * g)


def _halo_dma_path(x_pad, w2d, bias, *, n, ho, wo, cin, kh, kw, stride,
                   out_dtype):
    """x_pad: (N, Hp, Wp, Cin) bf16; w2d: (KH*KW*Cin, Cout_p) bf16 (BN folded);
    bias: (1, Cout_p) f32.  Returns (N, Ho, Wo, Cout_p)."""
    hp, wp = x_pad.shape[1], x_pad.shape[2]
    cout_p = w2d.shape[1]
    k = kh * kw * cin

    tile_ho = _pick_tile_ho_halo(ho, wo, wp, cin, kh, kw, stride, n)
    n_tiles = -(-ho // tile_ho)
    block_h_in = (tile_ho - 1) * stride + kh
    m_rows = tile_ho * wo

    # Pad input rows so every tile's halo DMA stays in bounds (ho need not
    # divide evenly; the extra output rows are sliced off below).
    hp_needed = (n_tiles * tile_ho - 1) * stride + kh
    if hp_needed > hp:
        x_pad = jnp.pad(x_pad, ((0, 0), (0, hp_needed - hp), (0, 0), (0, 0)))
        wp = x_pad.shape[2]

    kernel = functools.partial(_halo_conv_kernel, kh_size=kh, kw_size=kw,
                               stride=stride, tile_ho=tile_ho, wo=wo,
                               n_tiles=n_tiles)

    est = (2 * block_h_in * wp * cin * 2   # 2-slot halo slab (bf16)
           + m_rows * k * 2                # patches scratch (bf16)
           + 2 * k * cout_p * 2            # weight blocks (double-buffered)
           + 2 * cout_p * 4                # bias blocks
           + 2 * m_rows * cout_p * 4       # output blocks
           + m_rows * cout_p * 4)          # f32 accumulator
    vmem_limit = int(min(64 << 20, max(32 << 20, 2 * est)))

    flops = 2 * n * ho * wo * k * cout_p
    bytes_accessed = int(n * n_tiles * block_h_in * wp * cin * 2
                         + k * cout_p * 2 + cout_p * 4
                         + n * n_tiles * m_rows * cout_p
                         * jnp.dtype(out_dtype).itemsize)

    out = pl.pallas_call(
        kernel,
        out_shape=jax.ShapeDtypeStruct((n, n_tiles * m_rows, cout_p), out_dtype),
        grid=(n, n_tiles),
        in_specs=[
            pl.BlockSpec(memory_space=pl.ANY),                  # x stays in HBM
            pl.BlockSpec((k, cout_p), lambda b, t: (0, 0)),
            pl.BlockSpec((1, cout_p), lambda b, t: (0, 0)),
        ],
        out_specs=pl.BlockSpec((1, m_rows, cout_p), lambda b, t: (b, t, 0)),
        scratch_shapes=[
            pltpu.VMEM((2, block_h_in, wp, cin), jnp.bfloat16),
            pltpu.VMEM((m_rows, k), jnp.bfloat16),
            pltpu.SemaphoreType.DMA((2,)),
        ],
        compiler_params=pltpu.CompilerParams(
            dimension_semantics=("parallel", "arbitrary"),
            vmem_limit_bytes=vmem_limit),
        cost_estimate=pl.CostEstimate(flops=flops, transcendentals=0,
                                      bytes_accessed=bytes_accessed),
    )(x_pad, w2d, bias)

    out = out.reshape(n, n_tiles * tile_ho, wo, cout_p)[:, :ho]
    return out                                              # (N, Ho, Wo, Cout_p)


# ----------------------------------------------------------------------------
# Public wrapper (matches the PyTorch module's NCHW f32 contract)
# ----------------------------------------------------------------------------
def conv_bn_relu(x_nchw, weight_oihw, gamma, beta, running_mean, running_var,
                 *, stride, padding, eps=1e-5):
    n, cin, h, w = x_nchw.shape
    cout, cin_w, kh, kw = weight_oihw.shape
    assert cin == cin_w
    ho = (h + 2 * padding - kh) // stride + 1
    wo = (w + 2 * padding - kw) // stride + 1
    cout_p = _round_up(cout, 128)              # lane-dense output channels
    out_dtype = x_nchw.dtype

    # ---- layout glue (plain XLA): NHWC, spatial pad, bf16 MXU inputs -------
    x_nhwc = jnp.transpose(x_nchw, (0, 2, 3, 1))
    x_pad = jnp.pad(x_nhwc,
                    ((0, 0), (padding, padding), (padding, padding), (0, 0)))
    x_pad = x_pad.astype(jnp.bfloat16)

    # ---- fold inference BatchNorm into the weights + a per-channel bias ----
    inv_std = 1.0 / jnp.sqrt(running_var.astype(jnp.float32) + eps)
    scale = gamma.astype(jnp.float32) * inv_std                     # (Cout,)
    bias = beta.astype(jnp.float32) - running_mean.astype(jnp.float32) * scale
    w_hwio = jnp.transpose(weight_oihw, (2, 3, 1, 0)).astype(jnp.float32)
    w_hwio = w_hwio * scale[None, None, None, :]     # fold in f32, then bf16
    w2d = w_hwio.reshape(kh * kw * cin, cout)
    w2d = jnp.pad(w2d, ((0, 0), (0, cout_p - cout))).astype(jnp.bfloat16)
    bias = jnp.pad(bias, (0, cout_p - cout)).reshape(1, cout_p)

    if cin < 128:
        out2d = _im2col_matmul_path(x_pad, w2d, bias, n=n, ho=ho, wo=wo,
                                    cin=cin, kh=kh, kw=kw, stride=stride,
                                    out_dtype=out_dtype)
        out_nhwc = out2d.reshape(n, ho, wo, cout_p)
    else:
        out_nhwc = _halo_dma_path(x_pad, w2d, bias, n=n, ho=ho, wo=wo,
                                  cin=cin, kh=kh, kw=kw, stride=stride,
                                  out_dtype=out_dtype)

    out_nhwc = out_nhwc[..., :cout]                       # drop lane padding
    return jnp.transpose(out_nhwc, (0, 3, 1, 2)).astype(out_dtype)   # NCHW


def _reference(x_nchw, weight_oihw, gamma, beta, running_mean, running_var,
               *, stride, padding, eps=1e-5):
    y = lax.conv_general_dilated(
        x_nchw.astype(jnp.float32), weight_oihw.astype(jnp.float32),
        window_strides=(stride, stride),
        padding=[(padding, padding), (padding, padding)],
        dimension_numbers=("NCHW", "OIHW", "NCHW"))
    inv_std = 1.0 / jnp.sqrt(running_var + eps)
    y = y * (gamma * inv_std)[None, :, None, None] + \
        (beta - running_mean * gamma * inv_std)[None, :, None, None]
    return jnp.maximum(y, 0.0)


if __name__ == "__main__":
    key = jax.random.PRNGKey(0)
    k_x, k_w, k_g, k_b, k_m, k_v = jax.random.split(key, 6)

    # ConvBNReLU(in_channels=4, out_channels=8, kernel_size=3, stride=1, padding=1)
    N, CIN, H, W = 2, 4, 16, 16
    COUT, K, STRIDE, PAD = 8, 3, 1, 1

    x = jax.random.normal(k_x, (N, CIN, H, W), jnp.float32)
    weight = jax.random.normal(k_w, (COUT, CIN, K, K), jnp.float32) * 0.1
    gamma = jax.random.uniform(k_g, (COUT,), jnp.float32, 0.5, 1.5)
    beta = jax.random.normal(k_b, (COUT,), jnp.float32) * 0.1
    running_mean = jax.random.normal(k_m, (COUT,), jnp.float32) * 0.1
    running_var = jax.random.uniform(k_v, (COUT,), jnp.float32, 0.5, 1.5)

    out = conv_bn_relu(x, weight, gamma, beta, running_mean, running_var,
                       stride=STRIDE, padding=PAD)
    out = jax.block_until_ready(out)
    ref = _reference(x, weight, gamma, beta, running_mean, running_var,
                     stride=STRIDE, padding=PAD)
    assert out.shape == (N, COUT, H, W)
    # bf16 MXU inputs (f32 accumulation) => loosened tolerance vs the f32 ref.
    assert jnp.allclose(out, ref, atol=5e-2, rtol=5e-2), "mismatch (small-Cin path)"

    # Also exercise the large-Cin path (double-buffered halo DMA, in-kernel im2col).
    N2, CIN2, H2, W2, COUT2 = 2, 128, 8, 8, 8
    x2 = jax.random.normal(k_x, (N2, CIN2, H2, W2), jnp.float32)
    w2 = jax.random.normal(k_w, (COUT2, CIN2, K, K), jnp.float32) * 0.05
    g2 = jax.random.uniform(k_g, (COUT2,), jnp.float32, 0.5, 1.5)
    b2 = jax.random.normal(k_b, (COUT2,), jnp.float32) * 0.1
    m2 = jax.random.normal(k_m, (COUT2,), jnp.float32) * 0.1
    v2 = jax.random.uniform(k_v, (COUT2,), jnp.float32, 0.5, 1.5)
    out2 = conv_bn_relu(x2, w2, g2, b2, m2, v2, stride=STRIDE, padding=PAD)
    out2 = jax.block_until_ready(out2)
    ref2 = _reference(x2, w2, g2, b2, m2, v2, stride=STRIDE, padding=PAD)
    assert out2.shape == (N2, COUT2, H2, W2)
    assert jnp.allclose(out2, ref2, atol=1e-1, rtol=1e-1), "mismatch (large-Cin path)"

    print("KERNEL_OK")
</pallas_src>

<mosaic_0001>
module attributes {stable_mosaic.version = 11 : i64} {
  func.func @_matmul_bias_relu_kernel(%arg0: i32, %arg1: i32, %arg2: memref<512x128xbf16, #tpu.memory_space<vmem>>, %arg3: memref<128x128xbf16, #tpu.memory_space<vmem>>, %arg4: memref<1x128xf32, #tpu.memory_space<vmem>>, %arg5: memref<512x128xf32, #tpu.memory_space<vmem>>) attributes {dimension_semantics = [#tpu.dimension_semantics<parallel>, #tpu.dimension_semantics<parallel>], iteration_bounds = array<i64: 1, 1>, scalar_prefetch = 0 : i64, scratch_operands = 0 : i64, tpu.core_type = #tpu.core_type<tc>, window_params = [{transform_indices = @transform_0, window_bounds = array<i64: 512, 128>}, {transform_indices = @transform_1, window_bounds = array<i64: 128, 128>}, {transform_indices = @transform_2, window_bounds = array<i64: 1, 128>}, {transform_indices = @transform_3, window_bounds = array<i64: 512, 128>}]} {
    %c0 = arith.constant 0 : index
    %c0_0 = arith.constant 0 : index
    %0 = vector.load %arg2[%c0, %c0_0] : memref<512x128xbf16, #tpu.memory_space<vmem>>, vector<512x128xbf16>
    %c0_1 = arith.constant 0 : index
    %c0_2 = arith.constant 0 : index
    %1 = vector.load %arg3[%c0_1, %c0_2] : memref<128x128xbf16, #tpu.memory_space<vmem>>, vector<128x128xbf16>
    %cst = arith.constant dense<0.000000e+00> : vector<512x128xf32>
    %2 = tpu.matmul %0, %1, %cst {dimension_numbers = #tpu.dot_dimension_numbers<[1], [0], [0], [1], [0, 0, 1, 1], [], []>} : vector<512x128xbf16>, vector<128x128xbf16>, vector<512x128xf32> -> vector<512x128xf32>
    %c0_3 = arith.constant 0 : index
    %c0_4 = arith.constant 0 : index
    %3 = vector.load %arg4[%c0_3, %c0_4] : memref<1x128xf32, #tpu.memory_space<vmem>>, vector<1x128xf32>
    %4 = vector.broadcast %3 : vector<1x128xf32> to vector<512x128xf32>
    %5 = arith.addf %2, %4 : vector<512x128xf32>
    %cst_5 = arith.constant 0.000000e+00 : f32
    %6 = vector.broadcast %cst_5 : f32 to vector<512x128xf32>
    %7 = arith.maximumf %5, %6 : vector<512x128xf32>
    %c0_6 = arith.constant 0 : index
    %c0_7 = arith.constant 0 : index
    %8 = vector.load %arg5[%c0_6, %c0_7] : memref<512x128xf32, #tpu.memory_space<vmem>>, vector<512x128xf32>
    tpu.vector_store %arg5[%c0_6, %c0_7], %7 {strides = array<i32>} : memref<512x128xf32, #tpu.memory_space<vmem>>, vector<512x128xf32>,
    return
  }
  func.func @transform_0(%arg0: i32, %arg1: i32) -> (i32, i32) {
    %c0_i32 = arith.constant 0 : i32
    %c0_i32_0 = arith.constant 0 : i32
    return %arg0, %c0_i32 : i32, i32
  }
  func.func @transform_1(%arg0: i32, %arg1: i32) -> (i32, i32) {
    %c0_i32 = arith.constant 0 : i32
    %c0_i32_0 = arith.constant 0 : i32
    return %c0_i32, %arg1 : i32, i32
  }
  func.func @transform_2(%arg0: i32, %arg1: i32) -> (i32, i32) {
    %c0_i32 = arith.constant 0 : i32
    %c0_i32_0 = arith.constant 0 : i32
    return %c0_i32, %arg1 : i32, i32
  }
  func.func @transform_3(%arg0: i32, %arg1: i32) -> (i32, i32) {
    %c0_i32 = arith.constant 0 : i32
    return %arg0, %arg1 : i32, i32
  }
}

</mosaic_0001>

<bundles_post_ra>
// kernel: tpu_custom_call.1
= control target key start
LH: loop header
LB: loop body
LE: loop exit
PB: predicated region body
PF: predicated region fallthrough
CT: control target
= control target key end

     0   :  { %8 = vsyncpa [#allocation3], 0  ;;  %s1234_s0 = inlined_call_operand.hbm [shape: bf16[512,128], index: 0, kind: input, shape index: {}]   ;;  %s1235_s1 = inlined_call_operand.hbm [shape: bf16[128,128], index: 1, kind: input, shape index: {}]   ;;  %s1236_s2 = inlined_call_operand.vmem [shape: f32[1,128], index: 2, kind: input, shape index: {}]   ;;  %s1237_s3 = inlined_call_operand.hbm [shape: f32[512,128], index: 3, kind: output, shape index: {}]  }
   0x1   :  { %9 = vsyncpa [#allocation6], 0 }
   0x2   :  { %10 = vsyncpa [#allocation4], 0  ;;  %s1102_s12 = smov [#allocation2]   ;;  %s1030_s16 = scalar_lea.hbm %s1234_s0, 4096 }
   0x3   :  { %s16_s13 = sshll.u32 %s1102_s12, 4  ;;  %p1031_p0 = scmp.ne.s32.totalorder %s1234_s0, %s1030_s16  ;;  %s17_s13 = int_to_ptr.vmem [resolvable:$true] %s16_s13 }
   0x4   :  { %p1034_p1 = scmp.lt.u32.totalorder %s1030_s16, %s1234_s0 }
   0x6   :  { %p1036_p2 = pnand %p1034_p1, %p1031_p0 }
   0x8   :  { %1039 = shalt.err (!%p1036_p2)
}
   0x9   :  { %s1040_s21 = scalar_lea.vmem %s17_s13, 4096  ;;  %p1045_p4 = scmp.lt.s32.totalorder %s17_s13, %s17_s13 }
   0xa   :  { %p1041_p3 = scmp.ne.s32.totalorder %s17_s13, %s1040_s21  ;;  %p1046_p5 = scmp.lt.s32.totalorder %s1040_s21, %s1040_s21 }
   0xc   :  { %p1047_p6 = por %p1046_p5, %p1045_p4 }
   0xe   :  { %p1048_p7 = pnand %p1047_p6, %p1041_p3 }
  0x10   :  { %1051 = shalt.err (!%p1048_p7)
}
  0x11   :  { %s1103_s22 = smov 64   ;;  %s1104_s23 = smov 4  }
  0x12   :  { %22 = dma.hbm_to_vmem [thread:$0]  %s1234_s0, 4096, %s17_s13, [#allocation3], %s1103_s22, %s1103_s22, %s1104_s23  }
  0x13   :  { %s1105_s26 = smov [#allocation5]   ;;  %s1052_s30 = scalar_lea.hbm %s1235_s1, 1024 }
  0x14   :  { %s28_s27 = sshll.u32 %s1105_s26, 4  ;;  %p1053_p8 = scmp.ne.s32.totalorder %s1235_s1, %s1052_s30  ;;  %s29_s27 = int_to_ptr.vmem [resolvable:$true] %s28_s27 }
  0x15   :  { %p1056_p9 = scmp.lt.u32.totalorder %s1052_s30, %s1235_s1 }
  0x17   :  { %p1058_p10 = pnand %p1056_p9, %p1053_p8 }
  0x19   :  { %1061 = shalt.err (!%p1058_p10)
}
  0x1a   :  { %s1062_s8 = scalar_lea.vmem %s29_s27, 1024  ;;  %p1067_p12 = scmp.lt.s32.totalorder %s29_s27, %s29_s27 }
  0x1b   :  { %p1063_p11 = scmp.ne.s32.totalorder %s29_s27, %s1062_s8  ;;  %p1068_p13 = scmp.lt.s32.totalorder %s1062_s8, %s1062_s8 }
  0x1d   :  { %p1069_p0 = por %p1068_p13, %p1067_p12 }
  0x1f   :  { %p1070_p1 = pnand %p1069_p0, %p1063_p11 }
  0x21   :  { %1073 = shalt.err (!%p1070_p1)
}
  0x22   :  { %34 = dma.hbm_to_vmem [thread:$0]  %s1235_s1, 1024, %s29_s27, [#allocation6], %s1103_s22, %s1103_s22, %s1104_s23  }
  0x23   :  { %1096 = dma.done.wait [#allocation3], 4096  }
  0x24   :  { %1097 = vsyncadd [#allocation3], 4294963200 }
  0x25   :  { %1098 = dma.done.wait [#allocation6], 1024  }
  0x26   :  { %1099 = vsyncadd [#allocation6], 4294966272  ;;  %v990_v0 = vld [vmem:[#allocation5] sm:$0xff]   ;;  %v991_v1 = vld [vmem:[#allocation5 + $0x8] sm:$0xff]  }
  0x27   :  { %887 = vmatprep.subr.bf16.mxu0 %v990_v0  ;;  %967 = vmatprep.subr.bf16.mxu1 %v990_v0  ;;  %v992_v2 = vld [vmem:[#allocation5 + $0x10] sm:$0xff]   ;;  %v993_v3 = vld [vmem:[#allocation5 + $0x18] sm:$0xff]   ;;  %v998_v4 = vld [vmem:[#allocation2] sm:$0xff]  }
  0x28   :  { %888 = vmatpush3.bf16.msra.mxu0 %v990_v0  ;;  %975 = vmatpush3.bf16.msra.mxu1 %v990_v0  ;;  %v999_v5 = vld [vmem:[#allocation2 + $0x80] sm:$0xff]   ;;  %v995_v7 = vld [vmem:[#allocation5 + $0x28] sm:$0xff]   ;;  %v996_v8 = vld [vmem:[#allocation5 + $0x30] sm:$0xff]  }
  0x29   :  { %889 = vmatprep.subr.bf16.mxu0 %v991_v1  ;;  %968 = vmatprep.subr.bf16.mxu1 %v991_v1  ;;  %v994_v6 = vld [vmem:[#allocation5 + $0x20] sm:$0xff]   ;;  %v997_v9 = vld [vmem:[#allocation5 + $0x38] sm:$0xff]   ;;  %v1000_v10 = vld [vmem:[#allocation2 + $0x8] sm:$0xff]  }
  0x2a   :  { %903 = vmatprep.mubr.bf16.mxu0 %v998_v4  ;;  %935 = vmatprep.mubr.bf16.mxu1 %v999_v5  ;;  %v1001_v11 = vld [vmem:[#allocation2 + $0x88] sm:$0xff]   ;;  %v1002_v12 = vld [vmem:[#allocation2 + $0x10] sm:$0xff]   ;;  %v1004_v14 = vld [vmem:[#allocation2 + $0x18] sm:$0xff]  }
  0x2b   :  { %v1003_v13 = vld [vmem:[#allocation2 + $0x90] sm:$0xff]   ;;  %v1005_v15 = vld [vmem:[#allocation2 + $0x98] sm:$0xff]   ;;  %v1006_v16 = vld [vmem:[#allocation2 + $0x20] sm:$0xff]  }
  0x2c   :  { %890 = vmatpush3.bf16.msra.mxu0 %v991_v1  ;;  %976 = vmatpush3.bf16.msra.mxu1 %v991_v1  ;;  %v1007_v17 = vld [vmem:[#allocation2 + $0xa0] sm:$0xff]   ;;  %v1008_v18 = vld [vmem:[#allocation2 + $0x28] sm:$0xff]   ;;  %v1010_v20 = vld [vmem:[#allocation2 + $0x30] sm:$0xff]  }
  0x2d   :  { %891 = vmatprep.subr.bf16.mxu0 %v992_v2  ;;  %969 = vmatprep.subr.bf16.mxu1 %v992_v2  ;;  %v1009_v19 = vld [vmem:[#allocation2 + $0xa8] sm:$0xff]   ;;  %v1011_v21 = vld [vmem:[#allocation2 + $0xb0] sm:$0xff]   ;;  %v1012_v22 = vld [vmem:[#allocation2 + $0x38] sm:$0xff]  }
  0x2e   :  { %v1013_v23 = vld [vmem:[#allocation2 + $0xb8] sm:$0xff]   ;;  %v1014_v24 = vld [vmem:[#allocation2 + $0x40] sm:$0xff]   ;;  %v1016_v26 = vld [vmem:[#allocation2 + $0x48] sm:$0xff]  }
  0x2f   :  { %v1015_v25 = vld [vmem:[#allocation2 + $0xc0] sm:$0xff]   ;;  %v1017_v27 = vld [vmem:[#allocation2 + $0xc8] sm:$0xff]   ;;  %v1018_v28 = vld [vmem:[#allocation2 + $0x50] sm:$0xff]  }
  0x30   :  { %892 = vmatpush3.bf16.msra.mxu0 %v992_v2  ;;  %977 = vmatpush3.bf16.msra.mxu1 %v992_v2  ;;  %v1019_v29 = vld [vmem:[#allocation2 + $0xd0] sm:$0xff]   ;;  %v1020_v30 = vld [vmem:[#allocation2 + $0x58] sm:$0xff]   ;;  %v1022_v32 = vld [vmem:[#allocation2 + $0x60] sm:$0xff]  }
  0x31   :  { %893 = vmatprep.subr.bf16.mxu0 %v993_v3  ;;  %970 = vmatprep.subr.bf16.mxu1 %v993_v3  ;;  %v1021_v31 = vld [vmem:[#allocation2 + $0xd8] sm:$0xff]   ;;  %v1023_v33 = vld [vmem:[#allocation2 + $0xe0] sm:$0xff]   ;;  %v1024_v34 = vld [vmem:[#allocation2 + $0x68] sm:$0xff]  }
  0x32   :  { %v1025_v35 = vld [vmem:[#allocation2 + $0xe8] sm:$0xff]   ;;  %v1026_v36 = vld [vmem:[#allocation2 + $0x70] sm:$0xff]   ;;  %v1028_v38 = vld [vmem:[#allocation2 + $0x78] sm:$0xff]  }
  0x33   :  { %v1027_v37 = vld [vmem:[#allocation2 + $0xf0] sm:$0xff]   ;;  %v1029_v39 = vld [vmem:[#allocation2 + $0xf8] sm:$0xff]   ;;  %v1156_v40 = vld [vmem:[%s1236_s2] ss:$0 sm:$0xff]  ;;  %s1106_s2 = smov [#allocation7]  }
  0x34   :  { %894 = vmatpush3.bf16.msra.mxu0 %v993_v3  ;;  %978 = vmatpush3.bf16.msra.mxu1 %v993_v3  ;;  %s793_s11 = sshll.u32 %s1106_s2, 4  ;;  %s794_s11 = int_to_ptr.vmem [resolvable:$true] %s793_s11 }
  0x35   :  { %895 = vmatprep.subr.bf16.mxu0 %v994_v6  ;;  %971 = vmatprep.subr.bf16.mxu1 %v994_v6  ;;  %s1074_s12 = scalar_lea.vmem %s794_s11, 8192  ;;  %p1079_p3 = scmp.lt.s32.totalorder %s794_s11, %s794_s11 }
  0x36   :  { %p1075_p2 = scmp.ne.s32.totalorder %s794_s11, %s1074_s12  ;;  %p1080_p4 = scmp.lt.s32.totalorder %s1074_s12, %s1074_s12 }
  0x38   :  { %896 = vmatpush3.bf16.msra.mxu0 %v994_v6  ;;  %979 = vmatpush3.bf16.msra.mxu1 %v994_v6  ;;  %p1081_p5 = por %p1080_p4, %p1079_p3 }
  0x39   :  { %897 = vmatprep.subr.bf16.mxu0 %v995_v7  ;;  %972 = vmatprep.subr.bf16.mxu1 %v995_v7 }
  0x3a   :  { %p1082_p6 = pnand %p1081_p5, %p1075_p2 }
  0x3c   :  { %898 = vmatpush3.bf16.msra.mxu0 %v995_v7  ;;  %980 = vmatpush3.bf16.msra.mxu1 %v995_v7 }
  0x3d   :  { %899 = vmatprep.subr.bf16.mxu0 %v996_v8  ;;  %973 = vmatprep.subr.bf16.mxu1 %v996_v8 }
  0x40   :  { %900 = vmatpush3.bf16.msra.mxu0 %v996_v8  ;;  %981 = vmatpush3.bf16.msra.mxu1 %v996_v8 }
  0x41   :  { %901 = vmatprep.subr.bf16.mxu0 %v997_v9  ;;  %974 = vmatprep.subr.bf16.mxu1 %v997_v9 }
  0x44   :  { %902 = vmatpush3.bf16.msra.mxu0 %v997_v9  ;;  %982 = vmatpush3.bf16.msra.mxu1 %v997_v9 }
  0x47   :  { %904 = vmatmul.mubr.bf16.vlgmr.msra.gmra.mrb[0].mxu0 %v1000_v10  ;;  %936 = vmatmul.mubr.bf16.vlgmr.msra.gmra.mrb[0].mxu1 %v1001_v11 }
  0x48   :  { %907 = vmatprep.mubr.bf16.mxu0 %v1002_v12  ;;  %939 = vmatprep.mubr.bf16.mxu1 %v1003_v13 }
  0x4f   :  { %908 = vmatmul.mubr.bf16.gmra.mrb[4].mxu0 %v1004_v14  ;;  %940 = vmatmul.mubr.bf16.gmra.mrb[4].mxu1 %v1005_v15 }
  0x50   :  { %911 = vmatprep.mubr.bf16.mxu0 %v1006_v16  ;;  %943 = vmatprep.mubr.bf16.mxu1 %v1007_v17 }
  0x57   :  { %912 = vmatmul.mubr.bf16.gmra.mrb[8].mxu0 %v1008_v18  ;;  %944 = vmatmul.mubr.bf16.gmra.mrb[8].mxu1 %v1009_v19 }
  0x58   :  { %915 = vmatprep.mubr.bf16.mxu0 %v1010_v20  ;;  %947 = vmatprep.mubr.bf16.mxu1 %v1011_v21 }
  0x5f   :  { %916 = vmatmul.mubr.bf16.gmra.mrb[12].mxu0 %v1012_v22  ;;  %948 = vmatmul.mubr.bf16.gmra.mrb[12].mxu1 %v1013_v23 }
  0x60   :  { %919 = vmatprep.mubr.bf16.mxu0 %v1014_v24  ;;  %951 = vmatprep.mubr.bf16.mxu1 %v1015_v25 }
  0x67   :  { %920 = vmatmul.mubr.bf16.gmra.mrb[16].mxu0 %v1016_v26  ;;  %952 = vmatmul.mubr.bf16.gmra.mrb[16].mxu1 %v1017_v27 }
  0x68   :  { %923 = vmatprep.mubr.bf16.mxu0 %v1018_v28  ;;  %955 = vmatprep.mubr.bf16.mxu1 %v1019_v29 }
  0x6f   :  { %924 = vmatmul.mubr.bf16.gmra.mrb[20].mxu0 %v1020_v30  ;;  %956 = vmatmul.mubr.bf16.gmra.mrb[20].mxu1 %v1021_v31 }
  0x70   :  { %927 = vmatprep.mubr.bf16.mxu0 %v1022_v32  ;;  %959 = vmatprep.mubr.bf16.mxu1 %v1023_v33 }
  0x77   :  { %928 = vmatmul.mubr.bf16.gmra.mrb[24].mxu0 %v1024_v34  ;;  %960 = vmatmul.mubr.bf16.gmra.mrb[24].mxu1 %v1025_v35 }
  0x78   :  { %931 = vmatprep.mubr.bf16.mxu0 %v1026_v36  ;;  %963 = vmatprep.mubr.bf16.mxu1 %v1027_v37 }
  0x7f   :  { %932 = vmatmul.mubr.bf16.gmra.mrb[28].mxu0 %v1028_v38  ;;  %964 = vmatmul.mubr.bf16.gmra.mrb[28].mxu1 %v1029_v39 }
 0x11a   :  { %v905_v41 = vpop.f32.mrb[0].mxu0  ;;  %v937_v42 = vpop.f32.mrb[0].mxu1 }
 0x11b   :  { %v414_v43 = vadd.f32 %v905_v41, %v1156_v40  ;;  %v542_v44 = vadd.f32 %v937_v42, %v1156_v40  ;;  %v405_v45 = vpop.f32.mrb[1].mxu0  ;;  %v533_v46 = vpop.f32.mrb[1].mxu1 }
 0x11c   :  { %v406_v47 = vadd.f32 %v1156_v40, %v405_v45  ;;  %v534_v48 = vadd.f32 %v1156_v40, %v533_v46  ;;  %v906_v49 = vpop.f32.mrb[2].mxu0  ;;  %v938_v50 = vpop.f32.mrb[2].mxu1 }
 0x11d   :  { %v662_v51 = vmax.f32 %v414_v43, 0.0  ;;  %v694_v52 = vmax.f32 %v542_v44, 0.0  ;;  %v417_v53 = vadd.f32 %v906_v49, %v1156_v40  ;;  %v545_v54 = vadd.f32 %v938_v50, %v1156_v40  ;;  %v408_v55 = vpop.f32.mrb[3].mxu0  ;;  %v536_v56 = vpop.f32.mrb[3].mxu1 }
 0x11e   :  { %v660_v57 = vmax.f32 %v406_v47, 0.0  ;;  %v692_v58 = vmax.f32 %v534_v48, 0.0  ;;  %v409_v59 = vadd.f32 %v1156_v40, %v408_v55  ;;  %v537_v60 = vadd.f32 %v1156_v40, %v536_v56 }
 0x11f   :  { %726 = vst [vmem:[#allocation7 + $0x10] sm:$0xff] %v662_v51  ;;  %758 = vst [vmem:[#allocation7 + $0x110] sm:$0xff] %v694_v52  ;;  %v663_v61 = vmax.f32 %v417_v53, 0.0  ;;  %v695_v62 = vmax.f32 %v545_v54, 0.0 }
 0x120   :  { %724 = vst [vmem:[#allocation7] sm:$0xff] %v660_v57  ;;  %756 = vst [vmem:[#allocation7 + $0x100] sm:$0xff] %v692_v58  ;;  %v661_v63 = vmax.f32 %v409_v59, 0.0  ;;  %v693_v0 = vmax.f32 %v537_v60, 0.0 }
 0x121   :  { %727 = vst [vmem:[#allocation7 + $0x18] sm:$0xff] %v663_v61  ;;  %759 = vst [vmem:[#allocation7 + $0x118] sm:$0xff] %v695_v62 }
 0x122   :  { %725 = vst [vmem:[#allocation7 + $0x8] sm:$0xff] %v661_v63  ;;  %757 = vst [vmem:[#allocation7 + $0x108] sm:$0xff] %v693_v0  ;;  %v909_v1 = vpop.f32.mrb[4].mxu0  ;;  %v941_v2 = vpop.f32.mrb[4].mxu1 }
 0x123   :  { %v430_v3 = vadd.f32 %v909_v1, %v1156_v40  ;;  %v558_v4 = vadd.f32 %v941_v2, %v1156_v40  ;;  %v421_v5 = vpop.f32.mrb[5].mxu0  ;;  %v549_v6 = vpop.f32.mrb[5].mxu1 }
 0x124   :  { %v422_v7 = vadd.f32 %v1156_v40, %v421_v5  ;;  %v550_v8 = vadd.f32 %v1156_v40, %v549_v6  ;;  %v910_v9 = vpop.f32.mrb[6].mxu0  ;;  %v942_v10 = vpop.f32.mrb[6].mxu1 }
 0x125   :  { %v666_v11 = vmax.f32 %v430_v3, 0.0  ;;  %v698_v12 = vmax.f32 %v558_v4, 0.0  ;;  %v433_v13 = vadd.f32 %v910_v9, %v1156_v40  ;;  %v561_v14 = vadd.f32 %v942_v10, %v1156_v40  ;;  %v424_v15 = vpop.f32.mrb[7].mxu0  ;;  %v552_v16 = vpop.f32.mrb[7].mxu1 }
 0x126   :  { %v664_v17 = vmax.f32 %v422_v7, 0.0  ;;  %v696_v18 = vmax.f32 %v550_v8, 0.0  ;;  %v425_v19 = vadd.f32 %v1156_v40, %v424_v15  ;;  %v553_v20 = vadd.f32 %v1156_v40, %v552_v16 }
 0x127   :  { %730 = vst [vmem:[#allocation7 + $0x30] sm:$0xff] %v666_v11  ;;  %762 = vst [vmem:[#allocation7 + $0x130] sm:$0xff] %v698_v12  ;;  %v667_v21 = vmax.f32 %v433_v13, 0.0  ;;  %v699_v22 = vmax.f32 %v561_v14, 0.0 }
 0x128   :  { %728 = vst [vmem:[#allocation7 + $0x20] sm:$0xff] %v664_v17  ;;  %760 = vst [vmem:[#allocation7 + $0x120] sm:$0xff] %v696_v18  ;;  %v665_v23 = vmax.f32 %v425_v19, 0.0  ;;  %v697_v24 = vmax.f32 %v553_v20, 0.0 }
 0x129   :  { %731 = vst [vmem:[#allocation7 + $0x38] sm:$0xff] %v667_v21  ;;  %763 = vst [vmem:[#allocation7 + $0x138] sm:$0xff] %v699_v22 }
 0x12a   :  { %729 = vst [vmem:[#allocation7 + $0x28] sm:$0xff] %v665_v23  ;;  %761 = vst [vmem:[#allocation7 + $0x128] sm:$0xff] %v697_v24  ;;  %v913_v25 = vpop.f32.mrb[8].mxu0  ;;  %v945_v26 = vpop.f32.mrb[8].mxu1 }
 0x12b   :  { %v446_v27 = vadd.f32 %v913_v25, %v1156_v40  ;;  %v574_v28 = vadd.f32 %v945_v26, %v1156_v40  ;;  %v437_v29 = vpop.f32.mrb[9].mxu0  ;;  %v565_v30 = vpop.f32.mrb[9].mxu1 }
 0x12c   :  { %v438_v31 = vadd.f32 %v1156_v40, %v437_v29  ;;  %v566_v32 = vadd.f32 %v1156_v40, %v565_v30  ;;  %v914_v33 = vpop.f32.mrb[10].mxu0  ;;  %v946_v34 = vpop.f32.mrb[10].mxu1 }
 0x12d   :  { %v670_v35 = vmax.f32 %v446_v27, 0.0  ;;  %v702_v36 = vmax.f32 %v574_v28, 0.0  ;;  %v449_v37 = vadd.f32 %v914_v33, %v1156_v40  ;;  %v577_v38 = vadd.f32 %v946_v34, %v1156_v40  ;;  %v440_v39 = vpop.f32.mrb[11].mxu0  ;;  %v568_v41 = vpop.f32.mrb[11].mxu1 }
 0x12e   :  { %v668_v42 = vmax.f32 %v438_v31, 0.0  ;;  %v700_v43 = vmax.f32 %v566_v32, 0.0  ;;  %v441_v44 = vadd.f32 %v1156_v40, %v440_v39  ;;  %v569_v45 = vadd.f32 %v1156_v40, %v568_v41 }
 0x12f   :  { %734 = vst [vmem:[#allocation7 + $0x50] sm:$0xff] %v670_v35  ;;  %766 = vst [vmem:[#allocation7 + $0x150] sm:$0xff] %v702_v36  ;;  %v671_v46 = vmax.f32 %v449_v37, 0.0  ;;  %v703_v47 = vmax.f32 %v577_v38, 0.0 }
 0x130   :  { %732 = vst [vmem:[#allocation7 + $0x40] sm:$0xff] %v668_v42  ;;  %764 = vst [vmem:[#allocation7 + $0x140] sm:$0xff] %v700_v43  ;;  %v669_v48 = vmax.f32 %v441_v44, 0.0  ;;  %v701_v49 = vmax.f32 %v569_v45, 0.0 }
 0x131   :  { %735 = vst [vmem:[#allocation7 + $0x58] sm:$0xff] %v671_v46  ;;  %767 = vst [vmem:[#allocation7 + $0x158] sm:$0xff] %v703_v47 }
 0x132   :  { %733 = vst [vmem:[#allocation7 + $0x48] sm:$0xff] %v669_v48  ;;  %765 = vst [vmem:[#allocation7 + $0x148] sm:$0xff] %v701_v49  ;;  %v917_v50 = vpop.f32.mrb[12].mxu0  ;;  %v949_v51 = vpop.f32.mrb[12].mxu1 }
 0x133   :  { %v462_v52 = vadd.f32 %v917_v50, %v1156_v40  ;;  %v590_v53 = vadd.f32 %v949_v51, %v1156_v40  ;;  %v453_v54 = vpop.f32.mrb[13].mxu0  ;;  %v581_v55 = vpop.f32.mrb[13].mxu1 }
 0x134   :  { %v454_v56 = vadd.f32 %v1156_v40, %v453_v54  ;;  %v582_v57 = vadd.f32 %v1156_v40, %v581_v55  ;;  %v918_v58 = vpop.f32.mrb[14].mxu0  ;;  %v950_v59 = vpop.f32.mrb[14].mxu1 }
 0x135   :  { %v674_v60 = vmax.f32 %v462_v52, 0.0  ;;  %v706_v61 = vmax.f32 %v590_v53, 0.0  ;;  %v465_v62 = vadd.f32 %v918_v58, %v1156_v40  ;;  %v593_v63 = vadd.f32 %v950_v59, %v1156_v40  ;;  %v456_v0 = vpop.f32.mrb[15].mxu0  ;;  %v584_v1 = vpop.f32.mrb[15].mxu1 }
 0x136   :  { %v672_v2 = vmax.f32 %v454_v56, 0.0  ;;  %v704_v3 = vmax.f32 %v582_v57, 0.0  ;;  %v457_v4 = vadd.f32 %v1156_v40, %v456_v0  ;;  %v585_v5 = vadd.f32 %v1156_v40, %v584_v1 }
 0x137   :  { %738 = vst [vmem:[#allocation7 + $0x70] sm:$0xff] %v674_v60  ;;  %770 = vst [vmem:[#allocation7 + $0x170] sm:$0xff] %v706_v61  ;;  %v675_v6 = vmax.f32 %v465_v62, 0.0  ;;  %v707_v7 = vmax.f32 %v593_v63, 0.0 }
 0x138   :  { %736 = vst [vmem:[#allocation7 + $0x60] sm:$0xff] %v672_v2  ;;  %768 = vst [vmem:[#allocation7 + $0x160] sm:$0xff] %v704_v3  ;;  %v673_v8 = vmax.f32 %v457_v4, 0.0  ;;  %v705_v9 = vmax.f32 %v585_v5, 0.0 }
 0x139   :  { %739 = vst [vmem:[#allocation7 + $0x78] sm:$0xff] %v675_v6  ;;  %771 = vst [vmem:[#allocation7 + $0x178] sm:$0xff] %v707_v7 }
 0x13a   :  { %737 = vst [vmem:[#allocation7 + $0x68] sm:$0xff] %v673_v8  ;;  %769 = vst [vmem:[#allocation7 + $0x168] sm:$0xff] %v705_v9  ;;  %v921_v10 = vpop.f32.mrb[16].mxu0  ;;  %v953_v11 = vpop.f32.mrb[16].mxu1 }
 0x13b   :  { %v478_v12 = vadd.f32 %v921_v10, %v1156_v40  ;;  %v606_v13 = vadd.f32 %v953_v11, %v1156_v40  ;;  %v469_v14 = vpop.f32.mrb[17].mxu0  ;;  %v597_v15 = vpop.f32.mrb[17].mxu1 }
 0x13c   :  { %v470_v16 = vadd.f32 %v1156_v40, %v469_v14  ;;  %v598_v17 = vadd.f32 %v1156_v40, %v597_v15  ;;  %v922_v18 = vpop.f32.mrb[18].mxu0  ;;  %v954_v19 = vpop.f32.mrb[18].mxu1 }
 0x13d   :  { %v678_v20 = vmax.f32 %v478_v12, 0.0  ;;  %v710_v21 = vmax.f32 %v606_v13, 0.0  ;;  %v481_v22 = vadd.f32 %v922_v18, %v1156_v40  ;;  %v609_v23 = vadd.f32 %v954_v19, %v1156_v40  ;;  %v472_v24 = vpop.f32.mrb[19].mxu0  ;;  %v600_v25 = vpop.f32.mrb[19].mxu1 }
 0x13e   :  { %v676_v26 = vmax.f32 %v470_v16, 0.0  ;;  %v708_v27 = vmax.f32 %v598_v17, 0.0  ;;  %v473_v28 = vadd.f32 %v1156_v40, %v472_v24  ;;  %v601_v29 = vadd.f32 %v1156_v40, %v600_v25 }
 0x13f   :  { %742 = vst [vmem:[#allocation7 + $0x90] sm:$0xff] %v678_v20  ;;  %774 = vst [vmem:[#allocation7 + $0x190] sm:$0xff] %v710_v21  ;;  %v679_v30 = vmax.f32 %v481_v22, 0.0  ;;  %v711_v31 = vmax.f32 %v609_v23, 0.0 }
 0x140   :  { %740 = vst [vmem:[#allocation7 + $0x80] sm:$0xff] %v676_v26  ;;  %772 = vst [vmem:[#allocation7 + $0x180] sm:$0xff] %v708_v27  ;;  %v677_v32 = vmax.f32 %v473_v28, 0.0  ;;  %v709_v33 = vmax.f32 %v601_v29, 0.0 }
 0x141   :  { %743 = vst [vmem:[#allocation7 + $0x98] sm:$0xff] %v679_v30  ;;  %775 = vst [vmem:[#allocation7 + $0x198] sm:$0xff] %v711_v31 }
 0x142   :  { %741 = vst [vmem:[#allocation7 + $0x88] sm:$0xff] %v677_v32  ;;  %773 = vst [vmem:[#allocation7 + $0x188] sm:$0xff] %v709_v33  ;;  %v925_v34 = vpop.f32.mrb[20].mxu0  ;;  %v957_v35 = vpop.f32.mrb[20].mxu1 }
 0x143   :  { %v494_v36 = vadd.f32 %v925_v34, %v1156_v40  ;;  %v622_v37 = vadd.f32 %v957_v35, %v1156_v40  ;;  %v485_v38 = vpop.f32.mrb[21].mxu0  ;;  %v613_v39 = vpop.f32.mrb[21].mxu1 }
 0x144   :  { %v486_v41 = vadd.f32 %v1156_v40, %v485_v38  ;;  %v614_v42 = vadd.f32 %v1156_v40, %v613_v39  ;;  %v926_v43 = vpop.f32.mrb[22].mxu0  ;;  %v958_v44 = vpop.f32.mrb[22].mxu1 }
 0x145   :  { %v682_v45 = vmax.f32 %v494_v36, 0.0  ;;  %v714_v46 = vmax.f32 %v622_v37, 0.0  ;;  %v497_v47 = vadd.f32 %v926_v43, %v1156_v40  ;;  %v625_v48 = vadd.f32 %v958_v44, %v1156_v40  ;;  %v488_v49 = vpop.f32.mrb[23].mxu0  ;;  %v616_v50 = vpop.f32.mrb[23].mxu1 }
 0x146   :  { %v680_v51 = vmax.f32 %v486_v41, 0.0  ;;  %v712_v52 = vmax.f32 %v614_v42, 0.0  ;;  %v489_v53 = vadd.f32 %v1156_v40, %v488_v49  ;;  %v617_v54 = vadd.f32 %v1156_v40, %v616_v50 }
 0x147   :  { %746 = vst [vmem:[#allocation7 + $0xb0] sm:$0xff] %v682_v45  ;;  %778 = vst [vmem:[#allocation7 + $0x1b0] sm:$0xff] %v714_v46  ;;  %v683_v55 = vmax.f32 %v497_v47, 0.0  ;;  %v715_v56 = vmax.f32 %v625_v48, 0.0 }
 0x148   :  { %744 = vst [vmem:[#allocation7 + $0xa0] sm:$0xff] %v680_v51  ;;  %776 = vst [vmem:[#allocation7 + $0x1a0] sm:$0xff] %v712_v52  ;;  %v681_v57 = vmax.f32 %v489_v53, 0.0  ;;  %v713_v58 = vmax.f32 %v617_v54, 0.0 }
 0x149   :  { %747 = vst [vmem:[#allocation7 + $0xb8] sm:$0xff] %v683_v55  ;;  %779 = vst [vmem:[#allocation7 + $0x1b8] sm:$0xff] %v715_v56 }
 0x14a   :  { %745 = vst [vmem:[#allocation7 + $0xa8] sm:$0xff] %v681_v57  ;;  %777 = vst [vmem:[#allocation7 + $0x1a8] sm:$0xff] %v713_v58  ;;  %v929_v59 = vpop.f32.mrb[24].mxu0  ;;  %v961_v60 = vpop.f32.mrb[24].mxu1 }
 0x14b   :  { %v510_v61 = vadd.f32 %v929_v59, %v1156_v40  ;;  %v638_v62 = vadd.f32 %v961_v60, %v1156_v40  ;;  %v501_v63 = vpop.f32.mrb[25].mxu0  ;;  %v629_v0 = vpop.f32.mrb[25].mxu1 }
 0x14c   :  { %v502_v1 = vadd.f32 %v1156_v40, %v501_v63  ;;  %v630_v2 = vadd.f32 %v1156_v40, %v629_v0  ;;  %v930_v3 = vpop.f32.mrb[26].mxu0  ;;  %v962_v4 = vpop.f32.mrb[26].mxu1 }
 0x14d   :  { %v686_v5 = vmax.f32 %v510_v61, 0.0  ;;  %v718_v6 = vmax.f32 %v638_v62, 0.0  ;;  %v513_v7 = vadd.f32 %v930_v3, %v1156_v40  ;;  %v641_v8 = vadd.f32 %v962_v4, %v1156_v40  ;;  %v504_v9 = vpop.f32.mrb[27].mxu0  ;;  %v632_v10 = vpop.f32.mrb[27].mxu1 }
 0x14e   :  { %v684_v11 = vmax.f32 %v502_v1, 0.0  ;;  %v716_v12 = vmax.f32 %v630_v2, 0.0  ;;  %v505_v13 = vadd.f32 %v1156_v40, %v504_v9  ;;  %v633_v14 = vadd.f32 %v1156_v40, %v632_v10 }
 0x14f   :  { %750 = vst [vmem:[#allocation7 + $0xd0] sm:$0xff] %v686_v5  ;;  %782 = vst [vmem:[#allocation7 + $0x1d0] sm:$0xff] %v718_v6  ;;  %v687_v15 = vmax.f32 %v513_v7, 0.0  ;;  %v719_v16 = vmax.f32 %v641_v8, 0.0 }
 0x150   :  { %748 = vst [vmem:[#allocation7 + $0xc0] sm:$0xff] %v684_v11  ;;  %780 = vst [vmem:[#allocation7 + $0x1c0] sm:$0xff] %v716_v12  ;;  %v685_v17 = vmax.f32 %v505_v13, 0.0  ;;  %v717_v18 = vmax.f32 %v633_v14, 0.0 }
 0x151   :  { %751 = vst [vmem:[#allocation7 + $0xd8] sm:$0xff] %v687_v15  ;;  %783 = vst [vmem:[#allocation7 + $0x1d8] sm:$0xff] %v719_v16 }
 0x152   :  { %749 = vst [vmem:[#allocation7 + $0xc8] sm:$0xff] %v685_v17  ;;  %781 = vst [vmem:[#allocation7 + $0x1c8] sm:$0xff] %v717_v18  ;;  %v933_v19 = vpop.f32.mrb[28].mxu0  ;;  %v965_v20 = vpop.f32.mrb[28].mxu1 }
 0x153   :  { %v526_v21 = vadd.f32 %v933_v19, %v1156_v40  ;;  %v654_v22 = vadd.f32 %v965_v20, %v1156_v40  ;;  %v517_v23 = vpop.f32.mrb[29].mxu0  ;;  %v645_v24 = vpop.f32.mrb[29].mxu1 }
 0x154   :  { %v518_v25 = vadd.f32 %v1156_v40, %v517_v23  ;;  %v646_v26 = vadd.f32 %v1156_v40, %v645_v24  ;;  %v934_v27 = vpop.f32.mrb[30].mxu0  ;;  %v966_v28 = vpop.f32.mrb[30].mxu1 }
 0x155   :  { %v690_v29 = vmax.f32 %v526_v21, 0.0  ;;  %v722_v30 = vmax.f32 %v654_v22, 0.0  ;;  %v529_v31 = vadd.f32 %v934_v27, %v1156_v40  ;;  %v657_v32 = vadd.f32 %v966_v28, %v1156_v40  ;;  %v520_v33 = vpop.f32.mrb[31].mxu0  ;;  %v648_v34 = vpop.f32.mrb[31].mxu1 }
 0x156   :  { %v688_v35 = vmax.f32 %v518_v25, 0.0  ;;  %v720_v36 = vmax.f32 %v646_v26, 0.0  ;;  %v521_v37 = vadd.f32 %v1156_v40, %v520_v33  ;;  %v649_v38 = vadd.f32 %v1156_v40, %v648_v34 }
 0x157   :  { %754 = vst [vmem:[#allocation7 + $0xf0] sm:$0xff] %v690_v29  ;;  %786 = vst [vmem:[#allocation7 + $0x1f0] sm:$0xff] %v722_v30  ;;  %v691_v39 = vmax.f32 %v529_v31, 0.0  ;;  %v723_v41 = vmax.f32 %v657_v32, 0.0 }
 0x158   :  { %752 = vst [vmem:[#allocation7 + $0xe0] sm:$0xff] %v688_v35  ;;  %784 = vst [vmem:[#allocation7 + $0x1e0] sm:$0xff] %v720_v36  ;;  %v689_v42 = vmax.f32 %v521_v37, 0.0  ;;  %v721_v43 = vmax.f32 %v649_v38, 0.0 }
 0x159   :  { %755 = vst [vmem:[#allocation7 + $0xf8] sm:$0xff] %v691_v39  ;;  %787 = vst [vmem:[#allocation7 + $0x1f8] sm:$0xff] %v723_v41 }
 0x15a   :  { %753 = vst [vmem:[#allocation7 + $0xe8] sm:$0xff] %v689_v42  ;;  %785 = vst [vmem:[#allocation7 + $0x1e8] sm:$0xff] %v721_v43 }
 0x15b   :  { %1085 = shalt.err (!%p1082_p6)
}
 0x15c   :  { %s1086_s15 = scalar_lea.hbm %s1237_s3, 8192 }
 0x15d   :  { %p1087_p7 = scmp.ne.s32.totalorder %s1237_s3, %s1086_s15  ;;  %p1090_p8 = scmp.lt.u32.totalorder %s1086_s15, %s1237_s3 }
 0x15f   :  { %p1092_p9 = pnand %p1090_p8, %p1087_p7 }
 0x161   :  { %1095 = shalt.err (!%p1092_p9)
}
 0x162   :  { %s1107_s20 = smov 128   ;;  %s1108_s21 = smov 8  }
 0x163   :  { %799 = dma.vmem_to_hbm [thread:$0]  %s794_s11, 8192, %s1237_s3, [#allocation4], %s1107_s20, %s1107_s20, %s1108_s21  }
 0x164   :  { %1100 = dma.done.wait [#allocation4], 8192  }
 0x165   :  { %1101 = vsyncadd [#allocation4], 4294959104 }
 0x166   :  { %803 = vsyncpa [#allocation3], 1 }
 0x167   :  { %804 = vsyncpa [#allocation6], 1 }
 0x168   :  { %805 = vsyncpa [#allocation4], 1 }

</bundles_post_ra>
